<compile_context>
chip_gen: v7x
topology: tpu7x:2x2x1
jax: 0.10.0
libtpu: 0.0.40
codegen_flags: <defaults>
</compile_context>

<pallas_src>
import functools
import math

import jax
import jax.numpy as jnp
from jax.experimental import pallas as pl
from jax.experimental.pallas import tpu as pltpu

# ----------------------------- config (small, deterministic) -----------------------------
BATCH = 2
SEQ = 8
HIDDEN = 32
NUM_HEADS = 4
HEAD_DIM = HIDDEN // NUM_HEADS
LANE = 128  # lane-block width used to pad the fused QKV projection


# --------------------------------------- kernel ---------------------------------------
def _encoder_attn_kernel(x_ref, wqkv_ref, wo_ref, o_ref, *, seq, num_heads):
    """Whole-batch multi-head self-attention in a single invocation.

    x_ref:    (T, D)        all tokens, batch flattened into rows (T = B*S)
    wqkv_ref: (D+1, 3*128)  fused q|k|v weight (rows 0..D-1) + bias (row D);
                            q/k/v each occupy lanes [0:D] of their own 128-lane block
    wo_ref:   (D+1, D)      output projection weight (rows 0..D-1) + bias (row D)
    o_ref:    (T, D)        output, token-major (single lane-dense store)
    """
    T, D = x_ref.shape
    H = num_heads
    HD = D // H
    S = seq

    x = x_ref[...]                                    # (T, D) f32

    # ---- fused QKV projection: one MXU matmul + one bias add ----------------
    qkv = jnp.dot(x, wqkv_ref[:D, :], preferred_element_type=jnp.float32)
    qkv = qkv + wqkv_ref[D:D + 1, :]                  # (T, 3*128)

    # 128-lane-block aligned slices (whole-vreg selects, no lane shifts).
    q = qkv[:, 0:D]                                   # pre-scaled by 1/sqrt(HD)
    k = qkv[:, LANE:LANE + D]
    v = qkv[:, 2 * LANE:2 * LANE + D]

    # ---- one-time head-major relayout (no stack-of-lane-slices) -------------
    # X.T -> (D, T); the leading-dim reshape to (H, HD, T) is free; one batched
    # minor-dims transpose yields (H, T, HD).  K stays as (H, HD, T) so the
    # score matmul below is already in plain (M,K)x(K,N) orientation.
    qh = jnp.swapaxes(q.T.reshape(H, HD, T), 1, 2)    # (H, T, HD)
    vh = jnp.swapaxes(v.T.reshape(H, HD, T), 1, 2)    # (H, T, HD)
    kht = k.T.reshape(H, HD, T)                       # (H, HD, T)

    # ---- batched attention over all B*S tokens at once ----------------------
    # Block-diagonal batch mask, added BEFORE the row max so cross-batch keys
    # never win the max nor contribute to the softmax denominator.
    # (division-free construction: batch id of row i, compared with its transpose)
    row_b = jax.lax.broadcasted_iota(jnp.int32, (T // S, S, T), 0).reshape(T, T)
    mask = jnp.where(row_b == row_b.T, 0.0, -1e30)    # (T, T) f32

    scores = jnp.einsum("hqd,hdk->hqk", qh, kht,
                        preferred_element_type=jnp.float32) + mask      # (H, T, T)

    # Numerically stable softmax, f32 throughout; EUP approx reciprocal for denom.
    m = jnp.max(scores, axis=-1, keepdims=True)
    p = jnp.exp(scores - m)
    p = p * pl.reciprocal(jnp.sum(p, axis=-1, keepdims=True), approx=True)

    ctx = jnp.einsum("hqk,hkd->hqd", p, vh,
                     preferred_element_type=jnp.float32)                # (H, T, HD)

    # Back to token-major (T, D) lane layout -> ONE (T,D)@(D,D) output matmul.
    ctx_td = jnp.swapaxes(ctx, 1, 2).reshape(D, T).T                    # (T, D)
    out = jnp.dot(ctx_td, wo_ref[:D, :], preferred_element_type=jnp.float32)
    out = out + wo_ref[D:D + 1, :]                                      # (T, D)

    # Single lane-dense store.
    o_ref[...] = out.astype(o_ref.dtype)


# --------------------------------------- wrapper ---------------------------------------
def encoder_forward(x, params):
    """x: [B, S, D] float32. params: dict of (x @ W oriented) weights/biases."""
    B, S, D = x.shape
    T = B * S
    assert D <= LANE and D % NUM_HEADS == 0
    scale = 1.0 / math.sqrt(HEAD_DIM)

    # ---- wrapper-side weight re-plumbing (cheap one-time XLA ops) ------------
    # Fold the attention scale into the Q projection.
    wq = params["wq"] * scale
    bq = params["bq"] * scale

    # Fused QKV weight: q|k|v each in its own 128-lane block so in-kernel slices
    # are vreg-boundary aligned; bias packed as an extra row -> one operand/DMA.
    wqkv = jnp.zeros((D, 3 * LANE), jnp.float32)
    wqkv = wqkv.at[:, 0:D].set(wq)
    wqkv = wqkv.at[:, LANE:LANE + D].set(params["wk"])
    wqkv = wqkv.at[:, 2 * LANE:2 * LANE + D].set(params["wv"])
    bqkv = jnp.zeros((1, 3 * LANE), jnp.float32)
    bqkv = bqkv.at[:, 0:D].set(bq)
    bqkv = bqkv.at[:, LANE:LANE + D].set(params["bk"])
    bqkv = bqkv.at[:, 2 * LANE:2 * LANE + D].set(params["bv"])
    wqkv_b = jnp.concatenate([wqkv, bqkv], axis=0)                  # (D+1, 3*128)

    # Output projection kept un-split; bias packed as an extra row.
    wo_b = jnp.concatenate([params["wo"], params["bo"]], axis=0)    # (D+1, D)

    x_flat = x.reshape(T, D)

    kernel = functools.partial(_encoder_attn_kernel, seq=S, num_heads=NUM_HEADS)

    # Single gridless invocation; the whole working set (~70 KB) lives in VMEM.
    # TODO(synk): if B*S ever grows, add a ("parallel",) batch grid so v7x's
    # second TensorCore is used and re-size tiles against its 64 MiB VMEM.
    out_flat = pl.pallas_call(
        kernel,
        out_shape=jax.ShapeDtypeStruct((T, D), x.dtype),
        in_specs=[pl.BlockSpec(memory_space=pltpu.MemorySpace.VMEM)] * 3,
        out_specs=pl.BlockSpec(memory_space=pltpu.MemorySpace.VMEM),
    )(x_flat, wqkv_b, wo_b)

    return out_flat.reshape(B, S, D)


def init_params(key, hidden):
    """Deterministic synthetic parameters (nn.Linear-style fan-in scaling).

    Weights are stored transposed relative to torch (shape [in, out]) so the
    kernel computes y = x @ W + b, matching torch's y = x @ W_t.T + b.
    """
    ks = jax.random.split(key, 8)
    bound = 1.0 / math.sqrt(hidden)

    def lin(kw, kb):
        w = jax.random.uniform(kw, (hidden, hidden), jnp.float32, -bound, bound)
        b = jax.random.uniform(kb, (1, hidden), jnp.float32, -bound, bound)
        return w, b

    wq, bq = lin(ks[0], ks[1])
    wk, bk = lin(ks[2], ks[3])
    wv, bv = lin(ks[4], ks[5])
    wo, bo = lin(ks[6], ks[7])
    return dict(wq=wq, bq=bq, wk=wk, bk=bk, wv=wv, bv=bv, wo=wo, bo=bo)


def reference_forward(x, p):
    """Pure-JAX reference for correctness checking."""
    q = x @ p["wq"] + p["bq"][0]
    k = x @ p["wk"] + p["bk"][0]
    v = x @ p["wv"] + p["bv"][0]
    B, S, D = x.shape
    qh = q.reshape(B, S, NUM_HEADS, HEAD_DIM).transpose(0, 2, 1, 3)
    kh = k.reshape(B, S, NUM_HEADS, HEAD_DIM).transpose(0, 2, 1, 3)
    vh = v.reshape(B, S, NUM_HEADS, HEAD_DIM).transpose(0, 2, 1, 3)
    scores = jnp.einsum("bhqd,bhkd->bhqk", qh, kh) / math.sqrt(HEAD_DIM)
    probs = jax.nn.softmax(scores, axis=-1)
    ctx = jnp.einsum("bhqk,bhkd->bhqd", probs, vh)
    ctx = ctx.transpose(0, 2, 1, 3).reshape(B, S, D)
    return ctx @ p["wo"] + p["bo"][0]


if __name__ == "__main__":
    key = jax.random.PRNGKey(0)
    k_x, k_p = jax.random.split(key)

    x = jax.random.normal(k_x, (BATCH, SEQ, HIDDEN), jnp.float32)
    params = init_params(k_p, HIDDEN)

    out = jax.block_until_ready(encoder_forward(x, params))
    ref = reference_forward(x, params)

    assert out.shape == (BATCH, SEQ, HIDDEN)
    # Slightly loose tolerance: approx (EUP) reciprocal in the softmax denominator.
    assert jnp.allclose(out, ref, atol=2e-3, rtol=2e-3), "mismatch vs JAX reference"

    print("KERNEL_OK")
</pallas_src>

<mosaic_0001>
module attributes {stable_mosaic.version = 11 : i64} {
  func.func @_encoder_attn_kernel(%arg0: memref<16x32xf32, #tpu.memory_space<vmem>>, %arg1: memref<33x384xf32, #tpu.memory_space<vmem>>, %arg2: memref<33x32xf32, #tpu.memory_space<vmem>>, %arg3: memref<16x32xf32, #tpu.memory_space<vmem>>) attributes {dimension_semantics = [], scalar_prefetch = 0 : i64, scratch_operands = 0 : i64, tpu.core_type = #tpu.core_type<tc>} {
    %c0 = arith.constant 0 : index
    %c0_0 = arith.constant 0 : index
    %0 = vector.load %arg0[%c0, %c0_0] : memref<16x32xf32, #tpu.memory_space<vmem>>, vector<16x32xf32>
    %c0_1 = arith.constant 0 : index
    %c0_2 = arith.constant 0 : index
    %1 = vector.load %arg1[%c0_1, %c0_2] : memref<33x384xf32, #tpu.memory_space<vmem>>, vector<32x384xf32>
    %cst = arith.constant dense<0.000000e+00> : vector<16x384xf32>
    %2 = tpu.matmul %0, %1, %cst {dimension_numbers = #tpu.dot_dimension_numbers<[1], [0], [0], [1], [0, 0, 1, 1], [], []>} : vector<16x32xf32>, vector<32x384xf32>, vector<16x384xf32> -> vector<16x384xf32>
    %c32 = arith.constant 32 : index
    %c0_3 = arith.constant 0 : index
    %3 = vector.load %arg1[%c32, %c0_3] : memref<33x384xf32, #tpu.memory_space<vmem>>, vector<1x384xf32>
    %4 = vector.broadcast %3 : vector<1x384xf32> to vector<16x384xf32>
    %5 = arith.addf %2, %4 : vector<16x384xf32>
    %6 = vector.extract_strided_slice %5 {offsets = [0, 0], sizes = [16, 32], strides = [1, 1]} : vector<16x384xf32> to vector<16x32xf32>
    %7 = vector.extract_strided_slice %5 {offsets = [0, 128], sizes = [16, 32], strides = [1, 1]} : vector<16x384xf32> to vector<16x32xf32>
    %8 = vector.extract_strided_slice %5 {offsets = [0, 256], sizes = [16, 32], strides = [1, 1]} : vector<16x384xf32> to vector<16x32xf32>
    %9 = tpu.transpose %6, [1, 0] : vector<16x32xf32> -> vector<32x16xf32>
    %10 = vector.shape_cast %9 : vector<32x16xf32> to vector<4x8x16xf32>
    %11 = tpu.transpose %10, [0, 2, 1] : vector<4x8x16xf32> -> vector<4x16x8xf32>
    %12 = tpu.transpose %8, [1, 0] : vector<16x32xf32> -> vector<32x16xf32>
    %13 = vector.shape_cast %12 : vector<32x16xf32> to vector<4x8x16xf32>
    %14 = tpu.transpose %13, [0, 2, 1] : vector<4x8x16xf32> -> vector<4x16x8xf32>
    %15 = tpu.transpose %7, [1, 0] : vector<16x32xf32> -> vector<32x16xf32>
    %16 = vector.shape_cast %15 : vector<32x16xf32> to vector<4x8x16xf32>
    %17 = tpu.iota {dimensions = array<i32: 0>} : vector<2x8x16xi32>
    %18 = vector.shape_cast %17 : vector<2x8x16xi32> to vector<16x16xi32>
    %19 = tpu.transpose %18, [1, 0] : vector<16x16xi32> -> vector<16x16xi32>
    %20 = arith.cmpi eq, %18, %19 : vector<16x16xi32>
    %cst_4 = arith.constant 0.000000e+00 : f32
    %cst_5 = arith.constant -1.000000e+30 : f32
    %21 = vector.broadcast %cst_4 : f32 to vector<16x16xf32>
    %22 = vector.broadcast %cst_5 : f32 to vector<16x16xf32>
    %23 = arith.select %20, %21, %22 : vector<16x16xi1>, vector<16x16xf32>
    "tpu.trace_start"() <{level = 10 : i32, message = "hqd,hdk->hqk"}> : () -> ()
    %cst_6 = arith.constant dense<0.000000e+00> : vector<4x16x16xf32>
    %24 = tpu.matmul %11, %16, %cst_6 {dimension_numbers = #tpu.dot_dimension_numbers<[2], [1], [1], [2], [0, 0, 0, 1, 1, 2], [0], [0]>} : vector<4x16x8xf32>, vector<4x8x16xf32>, vector<4x16x16xf32> -> vector<4x16x16xf32>
    "tpu.trace_stop"() : () -> ()
    %25 = vector.shape_cast %23 : vector<16x16xf32> to vector<1x16x16xf32>
    %26 = vector.broadcast %25 : vector<1x16x16xf32> to vector<4x16x16xf32>
    %27 = arith.addf %24, %26 : vector<4x16x16xf32>
    %cst_7 = arith.constant dense<0xFF800000> : vector<4x16xf32>
    %28 = vector.multi_reduction <maximumf>, %27, %cst_7 [2] : vector<4x16x16xf32> to vector<4x16xf32>
    %29 = vector.shape_cast %28 : vector<4x16xf32> to vector<4x16x1xf32>
    %30 = vector.broadcast %29 : vector<4x16x1xf32> to vector<4x16x16xf32>
    %31 = arith.subf %27, %30 : vector<4x16x16xf32>
    %32 = math.exp %31 : vector<4x16x16xf32>
    %cst_8 = arith.constant dense<0.000000e+00> : vector<4x16xf32>
    %33 = vector.multi_reduction <add>, %32, %cst_8 [2] : vector<4x16x16xf32> to vector<4x16xf32>
    %34 = vector.shape_cast %33 : vector<4x16xf32> to vector<4x16x1xf32>
    %35 = tpu.reciprocal %34 {approx = true} : vector<4x16x1xf32> -> vector<4x16x1xf32>
    %36 = vector.broadcast %35 : vector<4x16x1xf32> to vector<4x16x16xf32>
    %37 = arith.mulf %32, %36 : vector<4x16x16xf32>
    "tpu.trace_start"() <{level = 10 : i32, message = "hqk,hkd->hqd"}> : () -> ()
    %cst_9 = arith.constant dense<0.000000e+00> : vector<4x16x8xf32>
    %38 = tpu.matmul %37, %14, %cst_9 {dimension_numbers = #tpu.dot_dimension_numbers<[2], [1], [1], [2], [0, 0, 0, 1, 1, 2], [0], [0]>} : vector<4x16x16xf32>, vector<4x16x8xf32>, vector<4x16x8xf32> -> vector<4x16x8xf32>
    "tpu.trace_stop"() : () -> ()
    %39 = tpu.transpose %38, [0, 2, 1] : vector<4x16x8xf32> -> vector<4x8x16xf32>
    %40 = vector.shape_cast %39 : vector<4x8x16xf32> to vector<32x16xf32>
    %41 = tpu.transpose %40, [1, 0] : vector<32x16xf32> -> vector<16x32xf32>
    %c0_10 = arith.constant 0 : index
    %c0_11 = arith.constant 0 : index
    %42 = vector.load %arg2[%c0_10, %c0_11] : memref<33x32xf32, #tpu.memory_space<vmem>>, vector<32x32xf32>
    %cst_12 = arith.constant dense<0.000000e+00> : vector<16x32xf32>
    %43 = tpu.matmul %41, %42, %cst_12 {dimension_numbers = #tpu.dot_dimension_numbers<[1], [0], [0], [1], [0, 0, 1, 1], [], []>} : vector<16x32xf32>, vector<32x32xf32>, vector<16x32xf32> -> vector<16x32xf32>
    %c32_13 = arith.constant 32 : index
    %c0_14 = arith.constant 0 : index
    %44 = vector.load %arg2[%c32_13, %c0_14] : memref<33x32xf32, #tpu.memory_space<vmem>>, vector<1x32xf32>
    %45 = vector.broadcast %44 : vector<1x32xf32> to vector<16x32xf32>
    %46 = arith.addf %43, %45 : vector<16x32xf32>
    %c0_15 = arith.constant 0 : index
    %c0_16 = arith.constant 0 : index
    %47 = vector.load %arg3[%c0_15, %c0_16] : memref<16x32xf32, #tpu.memory_space<vmem>>, vector<16x32xf32>
    tpu.vector_store %arg3[%c0_15, %c0_16], %46 {strides = array<i32>} : memref<16x32xf32, #tpu.memory_space<vmem>>, vector<16x32xf32>,
    return
  }
}

</mosaic_0001>

<bundles_post_ra>
// kernel: tpu_custom_call.1
= control target key start
LH: loop header
LB: loop body
LE: loop exit
PB: predicated region body
PF: predicated region fallthrough
CT: control target
= control target key end

     0   :  { %8 = vsyncpa [#allocation3], 0  ;;  %s1889_s0 = inlined_call_operand.vmem [shape: f32[16,32], index: 0, kind: input, shape index: {}]   ;;  %s1890_s1 = inlined_call_operand.hbm [shape: f32[33,384], index: 1, kind: input, shape index: {}]   ;;  %s1891_s2 = inlined_call_operand.vmem [shape: f32[33,32], index: 2, kind: input, shape index: {}]   ;;  %s1892_s3 = inlined_call_operand.hbm [shape: f32[16,32], index: 3, kind: output, shape index: {}]  }
   0x1   :  { %9 = vsyncpa [#allocation4], 0  ;;  %s1738_s12 = smov [#allocation2]   ;;  %s1690_s16 = scalar_lea.hbm %s1890_s1, 1920 }
   0x2   :  { %s17_s13 = sshll.u32 %s1738_s12, 4  ;;  %p1691_p0 = scmp.ne.s32.totalorder %s1890_s1, %s1690_s16  ;;  %s18_s13 = int_to_ptr.vmem [resolvable:$true] %s17_s13 }
   0x3   :  { %p1694_p1 = scmp.lt.u32.totalorder %s1690_s16, %s1890_s1 }
   0x5   :  { %p1696_p2 = pnand %p1694_p1, %p1691_p0 }
   0x7   :  { %1699 = shalt.err (!%p1696_p2)
}
   0x8   :  { %s1700_s21 = scalar_lea.vmem %s18_s13, 1920  ;;  %p1705_p4 = scmp.lt.s32.totalorder %s18_s13, %s18_s13 }
   0x9   :  { %p1701_p3 = scmp.ne.s32.totalorder %s18_s13, %s1700_s21  ;;  %p1706_p5 = scmp.lt.s32.totalorder %s1700_s21, %s1700_s21 }
   0xb   :  { %p1707_p6 = por %p1706_p5, %p1705_p4 }
   0xd   :  { %p1708_p7 = pnand %p1707_p6, %p1701_p3 }
   0xf   :  { %1711 = shalt.err (!%p1708_p7)
}
  0x10   :  { %s1739_s22 = smov 384   ;;  %s1740_s23 = smov 24  }
  0x11   :  { %23 = dma.hbm_to_vmem [thread:$0]  %s1890_s1, 1920, %s18_s13, [#allocation3], %s1739_s22, %s1739_s22, %s1740_s23  }
  0x12   :  { %1734 = dma.done.wait [#allocation3], 1920  }
  0x13   :  { %1735 = vsyncadd [#allocation3], 4294965376  ;;  %v1741_v0 = vmov 0.0   ;;  %v32_v1 = vld [vmem:[#allocation2 + $0x8] sm:$0xff]  ;;  %v35_v2 = vld [vmem:[#allocation2 + $0x20] sm:$0xff]  ;;  %vm61_vm0 = vcmask 261120   ;;  %v46_v15 = vlaneseq }
  0x14   :  { %132 = vmatprep.mubr.f32.mxu0 %v1741_v0  ;;  %v31_v3 = vld [vmem:[#allocation2] sm:$0xff]  ;;  %v1624_v4 = vpack.c.bf16 %v35_v2, %v32_v1  ;;  %v34_v5 = vld [vmem:[#allocation2 + $0x18] sm:$0xff]  ;;  %v41_v7 = vld [vmem:[#allocation2 + $0x50] sm:$0xff]  ;;  %v1742_v44 = vmov 0   ;;  %v1743_v45 = vmov 1   ;;  %vm480_vm1 = vcmask 64512  }
  0x15   :  { %v38_v6 = vld [vmem:[#allocation2 + $0x38] sm:$0xff]  ;;  %v1626_v8 = vpack.c.bf16 %v34_v5, %v31_v3  ;;  %v37_v10 = vld [vmem:[#allocation2 + $0x30] sm:$0xff]  ;;  %v40_v11 = vld [vmem:[#allocation2 + $0x48] sm:$0xff]  ;;  %v1789_v16 = vshrl.u32 %v46_v15, 7  ;;  %v1744_v58 = vmov -1e+30  }
  0x16   :  { %v1628_v9 = vpack.c.bf16 %v41_v7, %v38_v6  ;;  %v29_v12 = vld [vmem:[%s1889_s0] sm:$0xff]  ;;  %1625 = vmatprep.subr.bf16.mxu0 %v1624_v4  ;;  %v1630_v13 = vpack.c.bf16 %v40_v11, %v37_v10  ;;  %v30_v14 = vld [vmem:[%s1889_s0 + $0x8] sm:$0xff]  ;;  %v33_v30 = vld [vmem:[#allocation2 + $0x10] sm:$0xff]  ;;  %vm805_vm4 = vcmask 130048   ;;  %s1745_s11 = smov [#allocation5]  }
  0x17   :  { %1570 = vmatprep.mubr.msk.f32.mxu1 %vm61_vm0, %v29_v12  ;;  %1627 = vmatpush1.bf16.msra.mxu0 %v1626_v8  ;;  %v48_v17 = vsub.s32 0, %v1789_v16  ;;  %v1792_v18 = vld [vmem:[#allocation2 + $0x60] ss:$8 sm:$0x7]  ;;  %v52_v19 = vsub.s32 1, %v1789_v16  ;;  %v42_v34 = vld [vmem:[#allocation2 + $0x58] sm:$0xff] }
  0x18   :  { %1629 = vmatprep.subr.bf16.mxu0 %v1628_v9  ;;  %v36_v31 = vld [vmem:[#allocation2 + $0x28] sm:$0xff]  ;;  %v39_v32 = vld [vmem:[#allocation2 + $0x40] sm:$0xff]  ;;  %s1487_s12 = sshll.u32 %s1745_s11, 4  ;;  %s1488_s12 = int_to_ptr.vmem [resolvable:$true] %s1487_s12 }
  0x19   :  { %v49_v20 = vrot.slane %v1792_v18, %v48_v17  ;;  %v53_v21 = vrot.slane %v1792_v18, %v52_v19  ;;  %v1632_v33 = vpack.c.bf16 %v36_v31, %v33_v30  ;;  %v1636_v35 = vpack.c.bf16 %v42_v34, %v39_v32  ;;  %s1712_s13 = scalar_lea.vmem %s1488_s12, 256  ;;  %p1717_p9 = scmp.lt.s32.totalorder %s1488_s12, %s1488_s12 }
  0x1a   :  { %p1713_p8 = scmp.ne.s32.totalorder %s1488_s12, %s1712_s13  ;;  %p1718_p10 = scmp.lt.s32.totalorder %s1712_s13, %s1712_s13 }
  0x1b   :  { %1631 = vmatpush1.bf16.msra.mxu0 %v1630_v13  ;;  %1633 = vmatprep.subr.bf16.mxu1 %v1632_v33 }
  0x1c   :  { %1635 = vmatpush3.bf16.msra.mxu1 %v1632_v33  ;;  %p1719_p11 = por %p1718_p10, %p1717_p9 }
  0x1d   :  { %1637 = vmatprep.subr.bf16.mxu1 %v1636_v35 }
  0x1e   :  { %1499 = vmatmul.mubr.msk.f32.vlgmr.msra.gmra.mrb[0].mxu0 %vm61_vm0, %v29_v12  ;;  %p1720_p12 = pnand %p1719_p11, %p1713_p8 }
  0x1f   :  { %138 = vmatprep.mubr.f32.mxu0 %v1741_v0 }
  0x20   :  { %1639 = vmatpush3.bf16.msra.mxu1 %v1636_v35 }
  0x22   :  { %1500 = vmatmul.mubr.msk.f32.gmra.mrb[2].mxu0 %vm61_vm0, %v30_v14 }
  0x23   :  { %1571 = vmatmul.mubr.msk.f32.vlgmr.msra.gmra.mrb[0].mxu1 %vm61_vm0, %v30_v14 }
  0xf1   :  { %v134_v22 = vpop.f32.mrb[0].mxu0 }
  0xf2   :  { %v136_v23 = vpop.f32.mrb[1].mxu0  ;;  %v135_v24 = vadd.f32 %v134_v22, %v49_v20 }
  0xf3   :  { %v137_v25 = vadd.f32 %v136_v23, %v53_v21 }
  0xf4   :  { %220 = vxpose.xlu0.b32.start [1/2] (short) (narrow) %v135_v24, 32 }
  0xf5   :  { %v140_v26 = vpop.f32.mrb[2].mxu0  ;;  %412 = vxpose.xlu1.b32.start [1/2] (short) (narrow) %v137_v25, 32 }
  0xf6   :  { %v141_v27 = vadd.f32 %v140_v26, %v49_v20  ;;  %v142_v28 = vpop.f32.mrb[3].mxu0  ;;  %v1798_v46 = vpop.f32.mrb[0].mxu1 }
  0xf7   :  { %v143_v29 = vadd.f32 %v142_v28, %v53_v21  ;;  %v1800_v47 = vpop.f32.mrb[1].mxu1 }
  0xf8   :  { %221 = vxpose.xlu0.b32.end [2/2] (short) (narrow) %v141_v27, 32 }
  0xf9   :  { %413 = vxpose.xlu1.b32.end [2/2] (short) (narrow) %v143_v29, 32 }
 0x174   :  { %v236_v36 = vpop.trf.xlu0 }
 0x175   :  { %252 = vxpose.xlu1.b32.start.end [1/1] (short) (narrow) %v236_v36, 16  ;;  %v428_v37 = vpop.trf.xlu1 }
 0x176   :  { %1573 = vmatprep.subr.mxu1 %v428_v37 }
 0x177   :  { %1574 = vmatpush3.msra.mxu1 %v428_v37 }
 0x178   :  { %v237_v38 = vpop.trf.xlu0 }
 0x179   :  { %284 = vxpose.xlu0.b32.start.end [1/1] (short) (narrow) %v237_v38, 16  ;;  %v429_v39 = vpop.trf.xlu1 }
 0x17a   :  { %1578 = vmatprep.subr.mxu0 %v429_v39 }
 0x17b   :  { %1579 = vmatpush3.msra.mxu0 %v429_v39 }
 0x17c   :  { %v238_v40 = vpop.trf.xlu0 }
 0x17d   :  { %316 = vxpose.xlu1.b32.start.end [1/1] (short) (narrow) %v238_v40, 16  ;;  %v430_v41 = vpop.trf.xlu1 }
 0x17e   :  { %1583 = vmatprep.subr.mxu1 %v430_v41 }
 0x180   :  { %v239_v42 = vpop.trf.xlu0 }
 0x181   :  { %348 = vxpose.xlu0.b32.start.end [1/1] (short) (narrow) %v239_v42, 16  ;;  %v431_v43 = vpop.trf.xlu1 }
 0x182   :  { %1588 = vmatprep.subr.mxu0 %v431_v43 }
 0x186   :  { %444 = vxpose.xlu0.b32.start [1/2] (short) (narrow) %v1742_v44, 16 }
 0x18a   :  { %445 = vxpose.xlu0.b32.end [2/2] (short) (narrow) %v1743_v45, 16 }
 0x1f5   :  { %v268_v48 = vpop.trf.xlu1 }
 0x1f6   :  { %1575 = vmatprep.mubr.msk.f32.mxu1 %vm480_vm1, %v268_v48 }
 0x1f9   :  { %v269_v49 = vpop.trf.xlu1  ;;  %v300_v50 = vpop.trf.xlu0 }
 0x1fa   :  { %1576 = vmatmul.mubr.msk.f32.vlgmr.msra.gmra.mrb[2].mxu1 %vm480_vm1, %v269_v49  ;;  %1580 = vmatprep.mubr.msk.f32.mxu0 %vm480_vm1, %v300_v50 }
 0x1fb   :  { %1584 = vmatpush3.msra.mxu1 %v430_v41 }
 0x1fd   :  { %v332_v51 = vpop.trf.xlu1  ;;  %v301_v52 = vpop.trf.xlu0 }
 0x1fe   :  { %1581 = vmatmul.mubr.msk.f32.vlgmr.msra.gmra.mrb[4].mxu0 %vm480_vm1, %v301_v52  ;;  %1585 = vmatprep.mubr.msk.f32.mxu1 %vm480_vm1, %v332_v51 }
 0x1ff   :  { %1589 = vmatpush3.msra.mxu0 %v431_v43 }
 0x201   :  { %v333_v53 = vpop.trf.xlu1  ;;  %v364_v54 = vpop.trf.xlu0 }
 0x202   :  { %1586 = vmatmul.mubr.msk.f32.vlgmr.msra.gmra.mrb[4].mxu1 %vm480_vm1, %v333_v53  ;;  %1590 = vmatprep.mubr.msk.f32.mxu0 %vm480_vm1, %v364_v54 }
 0x205   :  { %v365_v55 = vpop.trf.xlu0 }
 0x206   :  { %1591 = vmatmul.mubr.msk.f32.vlgmr.msra.gmra.mrb[6].mxu0 %vm480_vm1, %v365_v55 }
 0x209   :  { %v460_v56 = vpop.trf.xlu0 }
 0x20a   :  { %vm476_vm3 = vcmp.eq.s32.totalorder %v460_v56, 0 }
 0x20b   :  { %v478_v60 = vsel %vm476_vm3, 0.0, %v1744_v58 }
 0x20d   :  { %v461_v57 = vpop.trf.xlu0 }
 0x20e   :  { %vm477_vm2 = vcmp.eq.s32.totalorder %v461_v57, 1 }
 0x20f   :  { %v479_v59 = vsel %vm477_vm2, 0.0, %v1744_v58 }
 0x2cd   :  { %v1577_v61 = vpop.f32.mrb[2].mxu1 }
 0x2ce   :  { %v559_v62 = vadd.f32 %v1577_v61, %v479_v59  ;;  %v553_v63 = vpop.f32.mrb[3].mxu1 }
 0x2cf   :  { %v554_v0 = vadd.f32 %v553_v63, %v478_v60 }
 0x2d0   :  { %v809_v1 = vsel %vm805_vm4, %v559_v62, -inf }
 0x2d1   :  { %v1582_v2 = vpop.f32.mrb[4].mxu0  ;;  %810 = vmax.xlane.f32.xlu0 %v809_v1  ;;  %v806_v3 = vsel %vm805_vm4, %v554_v0, -inf  ;;  %v56_v1 = vsub.s32 2, %v1789_v16 }
 0x2d2   :  { %v640_v4 = vadd.f32 %v1582_v2, %v479_v59  ;;  %v634_v5 = vpop.f32.mrb[5].mxu0  ;;  %807 = vmax.xlane.f32.xlu1 %v806_v3 }
 0x2d3   :  { %v635_v7 = vadd.f32 %v634_v5, %v478_v60  ;;  %v57_v2 = vrot.slane %v1792_v18, %v56_v1 }
 0x2d4   :  { %v815_v6 = vsel %vm805_vm4, %v640_v4, -inf }
 0x2d5   :  { %v1587_v8 = vpop.f32.mrb[4].mxu1  ;;  %v812_v14 = vsel %vm805_vm4, %v635_v7, -inf  ;;  %v212_v3 = vadd.f32 %v1800_v47, %v57_v2 }
 0x2d6   :  { %v721_v9 = vadd.f32 %v1587_v8, %v479_v59  ;;  %v715_v10 = vpop.f32.mrb[5].mxu1  ;;  %816 = vmax.xlane.f32.xlu1 %v815_v6 }
 0x2d7   :  { %v716_v12 = vadd.f32 %v715_v10, %v478_v60 }
 0x2d8   :  { %v821_v11 = vsel %vm805_vm4, %v721_v9, -inf }
 0x2d9   :  { %v1592_v13 = vpop.f32.mrb[6].mxu0  ;;  %822 = vmax.xlane.f32.xlu0 %v821_v11  ;;  %v818_v21 = vsel %vm805_vm4, %v716_v12, -inf }
 0x2da   :  { %v802_v15 = vadd.f32 %v1592_v13, %v479_v59  ;;  %v796_v17 = vpop.f32.mrb[7].mxu0  ;;  %813 = vmax.xlane.f32.xlu1 %v812_v14 }
 0x2db   :  { %v797_v20 = vadd.f32 %v796_v17, %v478_v60 }
 0x2dc   :  { %v827_v19 = vsel %vm805_vm4, %v802_v15, -inf }
 0x2dd   :  { %828 = vmax.xlane.f32.xlu0 %v827_v19  ;;  %v824_v22 = vsel %vm805_vm4, %v797_v20, -inf }
 0x2de   :  { %819 = vmax.xlane.f32.xlu1 %v818_v21 }
 0x2e2   :  { %825 = vmax.xlane.f32.xlu1 %v824_v22 }
 0x35e   :  { %v811_v23 = vpop.xlane.xlu0 %810 }
 0x35f   :  { %v831_v24 = vsub.f32 %v559_v62, %v811_v23  ;;  %v808_v25 = vpop.xlane.xlu1 %807 }
 0x360   :  { %v830_v26 = vsub.f32 %v554_v0, %v808_v25 }
 0x361   :  { %v840_v27 = vmul.f32 1.442695, %v831_v24 }
 0x362   :  { %v838_v28 = vmul.f32 1.442695, %v830_v26 }
 0x363   :  { %1658 = vpow2.f32 %v840_v27  ;;  %v817_v29 = vpop.xlane.xlu1 %816 }
 0x364   :  { %1660 = vpow2.f32 %v838_v28  ;;  %v833_v30 = vsub.f32 %v640_v4, %v817_v29  ;;  %v217_v4 = vadd.f32 %v1798_v46, %v57_v2 }
 0x366   :  { %v844_v31 = vmul.f32 1.442695, %v833_v30  ;;  %v823_v32 = vpop.xlane.xlu0 %822 }
 0x367   :  { %v835_v33 = vsub.f32 %v721_v9, %v823_v32  ;;  %v814_v34 = vpop.xlane.xlu1 %813 }
 0x368   :  { %1662 = vpow2.f32 %v844_v31  ;;  %v832_v35 = vsub.f32 %v635_v7, %v814_v34 }
 0x369   :  { %v848_v36 = vmul.f32 1.442695, %v835_v33 }
 0x36a   :  { %v842_v37 = vmul.f32 1.442695, %v832_v35  ;;  %v829_v38 = vpop.xlane.xlu0 %828 }
 0x36b   :  { %1664 = vpow2.f32 %v848_v36  ;;  %v837_v39 = vsub.f32 %v802_v15, %v829_v38  ;;  %v820_v40 = vpop.xlane.xlu1 %819 }
 0x36c   :  { %1666 = vpow2.f32 %v842_v37  ;;  %v834_v41 = vsub.f32 %v716_v12, %v820_v40  ;;  %v1391_v40 = vld [vmem:[%s1891_s2 + $0x8] sm:$0xff] }
 0x36d   :  { %v1818_v42 = vpop.eup %1658  ;;  %v852_v43 = vmul.f32 1.442695, %v837_v39  ;;  %v1390_v39 = vld [vmem:[%s1891_s2] sm:$0xff] }
 0x36e   :  { %v1661_v44 = vpop.eup %1660  ;;  %v846_v45 = vmul.f32 1.442695, %v834_v41  ;;  %v857_v48 = vsel %vm805_vm4, %v1818_v42, 0.0  ;;  %v1640_v41 = vpack.c.bf16 %v1391_v40, %v1390_v39 }
 0x36f   :  { %1668 = vpow2.f32 %v852_v43  ;;  %v826_v49 = vpop.xlane.xlu1 %825  ;;  %858 = vadd.xlane.f32.xlu0 %v857_v48  ;;  %v854_v50 = vsel %vm805_vm4, %v1661_v44, 0.0  ;;  %v1392_v43 = vld [vmem:[%s1891_s2 + $0x10] sm:$0xff] }
 0x370   :  { %1670 = vpow2.f32 %v846_v45  ;;  %v836_v51 = vsub.f32 %v797_v20, %v826_v49  ;;  %855 = vadd.xlane.f32.xlu1 %v854_v50 }
 0x372   :  { %v1663_v52 = vpop.eup %1662  ;;  %v850_v53 = vmul.f32 1.442695, %v836_v51 }
 0x373   :  { %v863_v54 = vsel %vm805_vm4, %v1663_v52, 0.0 }
 0x374   :  { %1672 = vpow2.f32 %v850_v53  ;;  %864 = vadd.xlane.f32.xlu0 %v863_v54  ;;  %v1523_v53 = vld [vmem:[%s1891_s2 + $0x20] ss:$0 sm:$0xff] }
 0x375   :  { %v1824_v55 = vpop.eup %1664 }
 0x376   :  { %v1667_v56 = vpop.eup %1666  ;;  %v869_v57 = vsel %vm805_vm4, %v1824_v55, 0.0 }
 0x377   :  { %v860_v58 = vsel %vm805_vm4, %v1667_v56, 0.0 }
 0x378   :  { %861 = vadd.xlane.f32.xlu1 %v860_v58  ;;  %870 = vadd.xlane.f32.xlu0 %v869_v57 }
 0x379   :  { %v1829_v59 = vpop.eup %1668 }
 0x37a   :  { %v1671_v60 = vpop.eup %1670  ;;  %v875_v61 = vsel %vm805_vm4, %v1829_v59, 0.0 }
 0x37b   :  { %v866_v62 = vsel %vm805_vm4, %v1671_v60, 0.0 }
 0x37c   :  { %867 = vadd.xlane.f32.xlu1 %v866_v62  ;;  %876 = vadd.xlane.f32.xlu0 %v875_v61 }
 0x37e   :  { %v1673_v63 = vpop.eup %1672 }
 0x37f   :  { %v872_v0 = vsel %vm805_vm4, %v1673_v63, 0.0 }
 0x380   :  { %873 = vadd.xlane.f32.xlu1 %v872_v0 }
 0x3b3   :  { %380 = vxpose.xlu1.b32.start [1/2] (short) (narrow) %v212_v3, 32 }
 0x3b7   :  { %381 = vxpose.xlu1.b32.end [2/2] (short) (narrow) %v217_v4, 32 }
 0x3fc   :  { %v859_v16 = vpop.xlane.xlu0 %858 }
 0x3fd   :  { %v856_v5 = vpop.xlane.xlu1 %855 }
 0x3fe   :  { %1674 = vrcp.f32 %v856_v5 }
 0x401   :  { %v865_v11 = vpop.xlane.xlu0 %864 }
 0x405   :  { %v862_v6 = vpop.xlane.xlu1 %861  ;;  %v871_v46 = vpop.xlane.xlu0 %870 }
 0x406   :  { %1676 = vrcp.f32 %v862_v6 }
 0x407   :  { %1678 = vrcp.f32 %v859_v16 }
 0x408   :  { %v1675_v7 = vpop.eup %1674 }
 0x409   :  { %v886_v8 = vmul.f32 %v1675_v7, %v1661_v44  ;;  %v868_v18 = vpop.xlane.xlu1 %867  ;;  %v877_v12 = vpop.xlane.xlu0 %876  ;;  %v1393_v44 = vld [vmem:[%s1891_s2 + $0x18] sm:$0xff] }
 0x40a   :  { %1680 = vrcp.f32 %v868_v18  ;;  %v1644_v45 = vpack.c.bf16 %v1393_v44, %v1392_v43 }
 0x40b   :  { %1595 = vmatprep.mubr.msk.f32.mxu1 %vm805_vm4, %v886_v8  ;;  %1682 = vrcp.f32 %v865_v11 }
 0x40d   :  { %v874_v47 = vpop.xlane.xlu1 %873 }
 0x40e   :  { %1684 = vrcp.f32 %v874_v47 }
 0x40f   :  { %1686 = vrcp.f32 %v871_v46 }
 0x410   :  { %v1677_v9 = vpop.eup %1676  ;;  %1688 = vrcp.f32 %v877_v12 }
 0x411   :  { %v888_v10 = vmul.f32 %v1677_v9, %v1667_v56  ;;  %v1679_v13 = vpop.eup %1678 }
 0x412   :  { %v887_v17 = vmul.f32 %v1679_v13, %v1818_v42 }
 0x413   :  { %1600 = vmatprep.mubr.msk.f32.mxu0 %vm805_vm4, %v888_v10 }
 0x414   :  { %v1681_v15 = vpop.eup %1680 }
 0x415   :  { %v1683_v19 = vpop.eup %1682  ;;  %v890_v21 = vmul.f32 %v1681_v15, %v1671_v60 }
 0x416   :  { %v889_v23 = vmul.f32 %v1683_v19, %v1663_v52 }
 0x418   :  { %v1685_v22 = vpop.eup %1684 }
 0x419   :  { %v1687_v24 = vpop.eup %1686  ;;  %v892_v26 = vmul.f32 %v1685_v22, %v1673_v63 }
 0x41a   :  { %v891_v27 = vmul.f32 %v1687_v24, %v1824_v55  ;;  %v1689_v28 = vpop.eup %1688 }
 0x41b   :  { %v893_v30 = vmul.f32 %v1689_v28, %v1829_v59 }
 0x433   :  { %v396_v14 = vpop.trf.xlu1 }
 0x434   :  { %1593 = vmatprep.subr.msk.mxu1 %vm805_vm4, %v396_v14 }
 0x435   :  { %1594 = vmatpush3.xpose.msk.msra.mxu1 %vm805_vm4, %v396_v14 }
 0x437   :  { %v397_v20 = vpop.trf.xlu1 }
 0x438   :  { %1596 = vmatmul.mubr.msk.f32.vlgmr.msra.gmra.mrb[6].mxu1 %vm805_vm4, %v887_v17  ;;  %1598 = vmatprep.subr.msk.mxu0 %vm805_vm4, %v397_v20 }
 0x439   :  { %1599 = vmatpush3.xpose.msk.msra.mxu0 %vm805_vm4, %v397_v20  ;;  %1605 = vmatprep.mubr.msk.f32.mxu1 %vm805_vm4, %v890_v21 }
 0x43b   :  { %v398_v25 = vpop.trf.xlu1 }
 0x43c   :  { %1601 = vmatmul.mubr.msk.f32.vlgmr.msra.gmra.mrb[8].mxu0 %vm805_vm4, %v889_v23  ;;  %1603 = vmatprep.subr.msk.mxu1 %vm805_vm4, %v398_v25 }
 0x43d   :  { %1604 = vmatpush3.xpose.msk.msra.mxu1 %vm805_vm4, %v398_v25  ;;  %1610 = vmatprep.mubr.msk.f32.mxu0 %vm805_vm4, %v892_v26 }
 0x43e   :  { %1641 = vmatprep.subr.bf16.mxu1 %v1640_v41 }
 0x43f   :  { %v399_v29 = vpop.trf.xlu1 }
 0x440   :  { %1606 = vmatmul.mubr.msk.f32.vlgmr.msra.gmra.mrb[8].mxu1 %vm805_vm4, %v891_v27  ;;  %1608 = vmatprep.subr.msk.mxu0 %vm805_vm4, %v399_v29 }
 0x441   :  { %1609 = vmatpush3.xpose.msk.msra.mxu0 %vm805_vm4, %v399_v29  ;;  %1643 = vmatpush3.bf16.msra.mxu1 %v1640_v41 }
 0x442   :  { %1645 = vmatprep.subr.bf16.mxu1 %v1644_v45 }
 0x444   :  { %1611 = vmatmul.mubr.msk.f32.vlgmr.msra.gmra.mrb[10].mxu0 %vm805_vm4, %v893_v30 }
 0x445   :  { %1647 = vmatpush3.bf16.msra.mxu1 %v1644_v45 }
 0x50b   :  { %v1597_v31 = vpop.f32.mrb[6].mxu1 }
 0x50c   :  { %v969_v32 = vpop.f32.mrb[7].mxu1 }
 0x50d   :  { %1230 = vxpose.xlu0.b32.start [1/2] (short) (narrow) %v969_v32, 8 }
 0x50f   :  { %v1602_v33 = vpop.f32.mrb[8].mxu0 }
 0x510   :  { %v1053_v34 = vpop.f32.mrb[9].mxu0 }
 0x511   :  { %1231 = vxpose.xlu0.b32.end [2/2] (short) (narrow) %v1597_v31, 8 }
 0x513   :  { %v1607_v35 = vpop.f32.mrb[8].mxu1 }
 0x514   :  { %v1137_v36 = vpop.f32.mrb[9].mxu1 }
 0x515   :  { %1262 = vxpose.xlu0.b32.start [1/2] (short) (narrow) %v1053_v34, 8  ;;  %1294 = vxpose.xlu1.b32.start [1/2] (short) (narrow) %v1137_v36, 8 }
 0x517   :  { %v1612_v37 = vpop.f32.mrb[10].mxu0 }
 0x518   :  { %v1221_v38 = vpop.f32.mrb[11].mxu0 }
 0x519   :  { %1263 = vxpose.xlu0.b32.end [2/2] (short) (narrow) %v1602_v33, 8  ;;  %1295 = vxpose.xlu1.b32.end [2/2] (short) (narrow) %v1607_v35, 8 }
 0x51d   :  { %1326 = vxpose.xlu0.b32.start [1/2] (short) (narrow) %v1221_v38, 8 }
 0x521   :  { %1327 = vxpose.xlu0.b32.end [2/2] (short) (narrow) %v1612_v37, 8 }
 0x58d   :  { %v1246_v42 = vpop.trf.xlu0 }
 0x58e   :  { %1358 = vxpose.xlu0.b32.start [1/4] (short) (narrow) %v1246_v42, 16 }
 0x595   :  { %v1278_v48 = vpop.trf.xlu0  ;;  %v1310_v49 = vpop.trf.xlu1 }
 0x596   :  { %1359 = vxpose.xlu0.b32.cont [2/4] (short) (narrow) %v1278_v48, 16 }
 0x59a   :  { %1360 = vxpose.xlu0.b32.cont [3/4] (short) (narrow) %v1310_v49, 16 }
 0x59d   :  { %v1342_v50 = vpop.trf.xlu0 }
 0x59e   :  { %1361 = vxpose.xlu0.b32.end [4/4] (short) (narrow) %v1342_v50, 16 }
 0x612   :  { %v1374_v51 = vpop.trf.xlu0 }
 0x613   :  { %1621 = vmatprep.mubr.msk.f32.mxu1 %vm61_vm0, %v1374_v51 }
 0x616   :  { %v1375_v52 = vpop.trf.xlu0 }
 0x617   :  { %1622 = vmatmul.mubr.msk.f32.vlgmr.msra.gmra.mrb[10].mxu1 %vm61_vm0, %v1375_v52 }
 0x6ea   :  { %v1623_v54 = vpop.f32.mrb[10].mxu1 }
 0x6eb   :  { %v1477_v55 = vadd.f32 %v1623_v54, %v1523_v53  ;;  %v1471_v56 = vpop.f32.mrb[11].mxu1 }
 0x6ec   :  { %v1472_v57 = vadd.f32 %v1523_v53, %v1471_v56 }
 0x6ed   :  { %1481 = vst.msk [vmem:[#allocation5 + $0x8] sm:$0xff] %vm61_vm0, %v1477_v55 }
 0x6ee   :  { %1480 = vst.msk [vmem:[#allocation5] sm:$0xff] %vm61_vm0, %v1472_v57 }
 0x6ef   :  { %1723 = shalt.err (!%p1720_p12)
}
 0x6f0   :  { %s1724_s15 = scalar_lea.hbm %s1892_s3, 256 }
 0x6f1   :  { %p1725_p13 = scmp.ne.s32.totalorder %s1892_s3, %s1724_s15  ;;  %p1728_p0 = scmp.lt.u32.totalorder %s1724_s15, %s1892_s3 }
 0x6f3   :  { %p1730_p1 = pnand %p1728_p0, %p1725_p13 }
 0x6f5   :  { %1733 = shalt.err (!%p1730_p1)
}
 0x6f6   :  { %s1746_s20 = smov 128   ;;  %s1747_s21 = smov 8  }
 0x6f7   :  { %1493 = dma.vmem_to_hbm [thread:$0]  %s1488_s12, 256, %s1892_s3, [#allocation4], %s1746_s20, %s1746_s20, %s1747_s21  }
 0x6f8   :  { %1736 = dma.done.wait [#allocation4], 256  }
 0x6f9   :  { %1737 = vsyncadd [#allocation4], 4294967040 }
 0x6fa   :  { %1497 = vsyncpa [#allocation3], 1 }
 0x6fb   :  { %1498 = vsyncpa [#allocation4], 1 }

</bundles_post_ra>
